<compile_context>
chip_gen: v7x
topology: tpu7x:2x2x1
jax: 0.10.0
libtpu: 0.0.40
codegen_flags: <defaults>
</compile_context>

<pallas_src>
import numpy as np
import jax
import jax.numpy as jnp
from jax import lax
from jax.experimental import pallas as pl
from jax.experimental.pallas import tpu as pltpu


def mha_kernel(q_ref, kp_ref, vp_ref, wq_ref, bq_ref, wo_ref, bo_ref,
               out_ref, attn_mean_ref, ho_ref, attn_acc_ref,
               *, heads, head_dim):
    # Q projection for this q-tile: bf16 MXU feeds, f32 accumulation.
    Qp = jnp.dot(q_ref[0].astype(jnp.bfloat16), wq_ref[...],
                 preferred_element_type=jnp.float32) + bq_ref[0]   # (TQ, D) f32
    Kp = kp_ref[0]                                                 # (Lk, D) bf16
    Vp = vp_ref[0]                                                 # (Lk, D) bf16

    scale = 1.0 / float(np.sqrt(head_dim))
    inv_heads = 1.0 / float(heads)

    # heads is a small static int -> unrolled loop with static lane slices.
    # Per-head (TQ, Lk) temporaries do not carry across iterations: the head
    # output lands in ho_ref and the attention map accumulates in VMEM scratch.
    for h in range(heads):
        lo = h * head_dim
        Qh = Qp[:, lo:lo + head_dim].astype(jnp.bfloat16)   # (TQ, hd)
        Kh = Kp[:, lo:lo + head_dim]                        # (Lk, hd)
        Vh = Vp[:, lo:lo + head_dim]                        # (Lk, hd)

        # scores: (TQ, Lk) — contraction on the last dims of both operands,
        # no materialized K transpose; f32 accumulation.
        S = lax.dot_general(Qh, Kh, (((1,), (1,)), ((), ())),
                            preferred_element_type=jnp.float32) * scale
        # numerically-stable softmax over keys, kept in f32; approx recip -> EUP
        S = S - jnp.max(S, axis=-1, keepdims=True)
        E = jnp.exp(S)
        A = E * pl.reciprocal(jnp.sum(E, axis=-1, keepdims=True), approx=True)

        # this head's output written in place at a static column slice
        ho_ref[:, lo:lo + head_dim] = jnp.dot(
            A.astype(jnp.bfloat16), Vh,
            preferred_element_type=jnp.float32).astype(ho_ref.dtype)

        if h == 0:
            attn_acc_ref[...] = A
        else:
            attn_acc_ref[...] += A

    out = jnp.dot(ho_ref[...], wo_ref[...],
                  preferred_element_type=jnp.float32) + bo_ref[0]
    out_ref[0] = out.astype(out_ref.dtype)
    attn_mean_ref[0] = (attn_acc_ref[...] * inv_heads).astype(attn_mean_ref.dtype)


def _vmem_estimate(tq, lk, d, attn_itemsize):
    """Rough f32/bf16 VMEM footprint (bytes) for a given q-tile size."""
    f32, bf16 = 4, 2
    blocks = (2 * tq * d * f32                 # q tile (double-buffered)
              + 2 * lk * d * bf16              # Kp + Vp (single-buffered)
              + 2 * d * d * bf16               # Wq + Wo (single-buffered)
              + 2 * d * f32                    # biases (single-buffered)
              + 2 * tq * d * f32               # out tile (double-buffered)
              + 2 * tq * lk * attn_itemsize)   # attn tile (double-buffered)
    scratch = tq * d * bf16 + tq * lk * f32
    temps = 3 * tq * lk * f32 + 2 * tq * d * f32   # S/E/A + Qp + headroom
    return blocks + scratch + temps


def _pick_q_tile(lq, lk, d, attn_itemsize, vmem_cap):
    """Largest q-tile that divides Lq and fits comfortably in the VMEM budget."""
    for t in (1024, 512, 256, 128, 64, 32, 16, 8):
        if lq % t == 0 and _vmem_estimate(t, lk, d, attn_itemsize) <= 0.7 * vmem_cap:
            return t
    return lq   # short sequences (or nothing smaller fits) -> single tile


def multihead_attention(q, k, v, params, *, heads, attn_mask=None,
                        attn_map_dtype=jnp.float32):
    """q: (B, Lq, D), k: (B, Lk, D), v: (B, Lk, D).  attn_mask path unsupported
    (matches reference module, which only works with attn_mask=None).
    attn_map_dtype can be set to jnp.bfloat16 to halve the O(Lq*Lk) writeback."""
    assert attn_mask is None, "attn_mask path is buggy/unsupported in the reference"
    B, Lq, D = q.shape
    Lk = k.shape[1]
    assert v.shape[1] == Lk
    head_dim = D // heads
    assert head_dim * heads == D
    wq, bq, wk, bk, wv, bv, wo, bo = params  # weights (D_in, D_out), biases (1, D)

    # Hoisted K/V projections (plain XLA batched matmuls, f32), then cast to
    # bf16 so the kernel receives half-width MXU feeds and half-size blocks.
    kp = (jnp.einsum('bld,de->ble', k, wk) + bk).astype(jnp.bfloat16)
    vp = (jnp.einsum('bld,de->ble', v, wv) + bv).astype(jnp.bfloat16)
    wq_b = wq.astype(jnp.bfloat16)
    wo_b = wo.astype(jnp.bfloat16)

    # Per-generation VMEM capacity (v5e/v6e 128 MiB, v7x 64 MiB per TC).
    try:
        vmem_cap = int(pltpu.get_tpu_info().vmem_capacity_bytes)
    except Exception:
        vmem_cap = 64 << 20   # conservative fallback = v7x per-TensorCore

    attn_itemsize = jnp.dtype(attn_map_dtype).itemsize
    TQ = _pick_q_tile(Lq, Lk, D, attn_itemsize, vmem_cap)
    nq = Lq // TQ
    est = _vmem_estimate(TQ, Lk, D, attn_itemsize)
    vmem_limit = int(min(max(2 * est, 32 << 20), vmem_cap))

    kernel = lambda *refs: mha_kernel(*refs, heads=heads, head_dim=head_dim)

    # Grid-invariant / per-batch-invariant operands: single-buffered.
    once = pl.Buffered(1)
    w_spec = pl.BlockSpec((D, D), lambda b, t: (0, 0), pipeline_mode=once)
    b_spec = pl.BlockSpec((1, D), lambda b, t: (0, 0), pipeline_mode=once)
    kv_spec = pl.BlockSpec((1, Lk, D), lambda b, t: (b, 0, 0), pipeline_mode=once)

    out, attn_mean = pl.pallas_call(
        kernel,
        out_shape=(
            jax.ShapeDtypeStruct((B, Lq, D), q.dtype),
            jax.ShapeDtypeStruct((B, Lq, Lk), attn_map_dtype),
        ),
        grid_spec=pltpu.PrefetchScalarGridSpec(
            num_scalar_prefetch=0,
            grid=(B, nq),
            in_specs=[
                pl.BlockSpec((1, TQ, D), lambda b, t: (b, t, 0)),   # q tile
                kv_spec,                                            # projected K (bf16)
                kv_spec,                                            # projected V (bf16)
                w_spec, b_spec,                                     # Wq (bf16), bq
                w_spec, b_spec,                                     # Wo (bf16), bo
            ],
            out_specs=[
                pl.BlockSpec((1, TQ, D), lambda b, t: (b, t, 0)),
                pl.BlockSpec((1, TQ, Lk), lambda b, t: (b, t, 0)),
            ],
            scratch_shapes=[
                pltpu.VMEM((TQ, D), jnp.bfloat16),   # per-head outputs (concat)
                pltpu.VMEM((TQ, Lk), jnp.float32),   # head-summed attention map
            ],
        ),
        compiler_params=pltpu.CompilerParams(
            # no cross-step scratch dependency remains -> both axes parallel
            # (lets v7x's 2 TensorCores split q-tiles even at B=1).
            dimension_semantics=("parallel", "parallel"),
            vmem_limit_bytes=vmem_limit),
    )(q, kp, vp, wq_b, bq, wo_b, bo)
    return out, attn_mean


def reference(q, k, v, params, *, heads):
    """Pure-JAX f32 reference mirroring the PyTorch forward (attn_mask=None)."""
    wq, bq, wk, bk, wv, bv, wo, bo = params
    B, Lq, D = q.shape
    Lk = k.shape[1]
    hd = D // heads
    Q = (q @ wq + bq).reshape(B, Lq, heads, hd)
    K = (k @ wk + bk).reshape(B, Lk, heads, hd)
    V = (v @ wv + bv).reshape(B, Lk, heads, hd)
    score = jnp.einsum('bqhd,bkhd->bhqk', Q, K)
    attn = jax.nn.softmax(score / np.sqrt(hd), axis=3)
    out = jnp.einsum('bhql,blhd->bqhd', attn, V).reshape(B, Lq, D)
    out = out @ wo + bo
    return out, attn.mean(axis=1)


if __name__ == "__main__":
    B, L, D, H = 2, 8, 32, 4
    key = jax.random.PRNGKey(0)
    ks = jax.random.split(key, 11)

    q = jax.random.normal(ks[0], (B, L, D), jnp.float32)
    k = jax.random.normal(ks[1], (B, L, D), jnp.float32)
    v = jax.random.normal(ks[2], (B, L, D), jnp.float32)

    # Deterministic "Linear" params; stored as (in, out) weights and (1, out)
    # biases (the transpose of torch's (out, in) weight, so y = x @ W + b).
    scale = 1.0 / np.sqrt(D)
    wq = jax.random.uniform(ks[3], (D, D), jnp.float32, -scale, scale)
    wk = jax.random.uniform(ks[4], (D, D), jnp.float32, -scale, scale)
    wv = jax.random.uniform(ks[5], (D, D), jnp.float32, -scale, scale)
    wo = jax.random.uniform(ks[6], (D, D), jnp.float32, -scale, scale)
    bq = jax.random.uniform(ks[7], (1, D), jnp.float32, -scale, scale)
    bk = jax.random.uniform(ks[8], (1, D), jnp.float32, -scale, scale)
    bv = jax.random.uniform(ks[9], (1, D), jnp.float32, -scale, scale)
    bo = jax.random.uniform(ks[10], (1, D), jnp.float32, -scale, scale)
    params = (wq, bq, wk, bk, wv, bv, wo, bo)

    out, attn_mean = multihead_attention(q, k, v, params, heads=H)
    jax.block_until_ready((out, attn_mean))

    ref_out, ref_attn = reference(q, k, v, params, heads=H)
    # tolerance accounts for bf16 MXU feeds (Q/K/V/W operands) and the
    # approx (EUP) reciprocal in the softmax denominator; a genuinely wrong
    # kernel would differ at the O(1) level.
    assert np.allclose(np.asarray(out), np.asarray(ref_out), atol=3e-2, rtol=3e-2)
    assert np.allclose(np.asarray(attn_mean), np.asarray(ref_attn), atol=2e-2, rtol=2e-2)

    print("KERNEL_OK")
</pallas_src>

<mosaic_0001>
module attributes {stable_mosaic.version = 11 : i64} {
  func.func @_lambda_(%arg0: i32, %arg1: i32, %arg2: memref<1x8x32xf32, #tpu.memory_space<vmem>>, %arg3: memref<1x8x32xbf16, #tpu.memory_space<vmem>>, %arg4: memref<1x8x32xbf16, #tpu.memory_space<vmem>>, %arg5: memref<32x32xbf16, #tpu.memory_space<vmem>>, %arg6: memref<1x32xf32, #tpu.memory_space<vmem>>, %arg7: memref<32x32xbf16, #tpu.memory_space<vmem>>, %arg8: memref<1x32xf32, #tpu.memory_space<vmem>>, %arg9: memref<1x8x32xf32, #tpu.memory_space<vmem>>, %arg10: memref<1x8x8xf32, #tpu.memory_space<vmem>>, %arg11: memref<8x32xbf16, #tpu.memory_space<vmem>>, %arg12: memref<8x8xf32, #tpu.memory_space<vmem>>) attributes {dimension_semantics = [#tpu.dimension_semantics<parallel>, #tpu.dimension_semantics<parallel>], iteration_bounds = array<i64: 2, 1>, scalar_prefetch = 0 : i64, scratch_operands = 2 : i64, tpu.core_type = #tpu.core_type<tc>, window_params = [{transform_indices = @transform_0, window_bounds = array<i64: 1, 8, 32>}, {pipeline_mode = #tpu.pipeline_mode<synchronous>, transform_indices = @transform_1, window_bounds = array<i64: 1, 8, 32>}, {pipeline_mode = #tpu.pipeline_mode<synchronous>, transform_indices = @transform_2, window_bounds = array<i64: 1, 8, 32>}, {pipeline_mode = #tpu.pipeline_mode<synchronous>, transform_indices = @transform_3, window_bounds = array<i64: 32, 32>}, {pipeline_mode = #tpu.pipeline_mode<synchronous>, transform_indices = @transform_4, window_bounds = array<i64: 1, 32>}, {pipeline_mode = #tpu.pipeline_mode<synchronous>, transform_indices = @transform_5, window_bounds = array<i64: 32, 32>}, {pipeline_mode = #tpu.pipeline_mode<synchronous>, transform_indices = @transform_6, window_bounds = array<i64: 1, 32>}, {transform_indices = @transform_7, window_bounds = array<i64: 1, 8, 32>}, {transform_indices = @transform_8, window_bounds = array<i64: 1, 8, 8>}]} {
    %c0 = arith.constant 0 : index
    %c0_0 = arith.constant 0 : index
    %c0_1 = arith.constant 0 : index
    %0 = vector.load %arg2[%c0, %c0_0, %c0_1] : memref<1x8x32xf32, #tpu.memory_space<vmem>>, vector<1x8x32xf32>
    %1 = vector.shape_cast %0 : vector<1x8x32xf32> to vector<8x32xf32>
    %2 = arith.truncf %1 : vector<8x32xf32> to vector<8x32xbf16>
    %c0_2 = arith.constant 0 : index
    %c0_3 = arith.constant 0 : index
    %3 = vector.load %arg5[%c0_2, %c0_3] : memref<32x32xbf16, #tpu.memory_space<vmem>>, vector<32x32xbf16>
    %cst = arith.constant dense<0.000000e+00> : vector<8x32xf32>
    %4 = tpu.matmul %2, %3, %cst {dimension_numbers = #tpu.dot_dimension_numbers<[1], [0], [0], [1], [0, 0, 1, 1], [], []>} : vector<8x32xbf16>, vector<32x32xbf16>, vector<8x32xf32> -> vector<8x32xf32>
    %c0_4 = arith.constant 0 : index
    %c0_5 = arith.constant 0 : index
    %5 = vector.load %arg6[%c0_4, %c0_5] : memref<1x32xf32, #tpu.memory_space<vmem>>, vector<1x32xf32>
    %6 = vector.shape_cast %5 : vector<1x32xf32> to vector<32xf32>
    %7 = vector.shape_cast %6 : vector<32xf32> to vector<1x32xf32>
    %8 = vector.broadcast %7 : vector<1x32xf32> to vector<8x32xf32>
    %9 = arith.addf %4, %8 : vector<8x32xf32>
    %c0_6 = arith.constant 0 : index
    %c0_7 = arith.constant 0 : index
    %c0_8 = arith.constant 0 : index
    %10 = vector.load %arg3[%c0_6, %c0_7, %c0_8] : memref<1x8x32xbf16, #tpu.memory_space<vmem>>, vector<1x8x32xbf16>
    %11 = vector.shape_cast %10 : vector<1x8x32xbf16> to vector<8x32xbf16>
    %c0_9 = arith.constant 0 : index
    %c0_10 = arith.constant 0 : index
    %c0_11 = arith.constant 0 : index
    %12 = vector.load %arg4[%c0_9, %c0_10, %c0_11] : memref<1x8x32xbf16, #tpu.memory_space<vmem>>, vector<1x8x32xbf16>
    %13 = vector.shape_cast %12 : vector<1x8x32xbf16> to vector<8x32xbf16>
    %14 = vector.extract_strided_slice %9 {offsets = [0, 0], sizes = [8, 8], strides = [1, 1]} : vector<8x32xf32> to vector<8x8xf32>
    %15 = arith.truncf %14 : vector<8x8xf32> to vector<8x8xbf16>
    %16 = vector.extract_strided_slice %11 {offsets = [0, 0], sizes = [8, 8], strides = [1, 1]} : vector<8x32xbf16> to vector<8x8xbf16>
    %17 = vector.extract_strided_slice %13 {offsets = [0, 0], sizes = [8, 8], strides = [1, 1]} : vector<8x32xbf16> to vector<8x8xbf16>
    %cst_12 = arith.constant dense<0.000000e+00> : vector<8x8xf32>
    %18 = tpu.matmul %15, %16, %cst_12 {dimension_numbers = #tpu.dot_dimension_numbers<[1], [1], [0], [0], [0, 0, 1, 0], [], []>} : vector<8x8xbf16>, vector<8x8xbf16>, vector<8x8xf32> -> vector<8x8xf32>
    %cst_13 = arith.constant 0.353553385 : f32
    %19 = vector.broadcast %cst_13 : f32 to vector<8x8xf32>
    %20 = arith.mulf %18, %19 : vector<8x8xf32>
    %cst_14 = arith.constant dense<0xFF800000> : vector<8xf32>
    %21 = vector.multi_reduction <maximumf>, %20, %cst_14 [1] : vector<8x8xf32> to vector<8xf32>
    %22 = vector.shape_cast %21 : vector<8xf32> to vector<8x1xf32>
    %23 = vector.broadcast %22 : vector<8x1xf32> to vector<8x8xf32>
    %24 = arith.subf %20, %23 : vector<8x8xf32>
    %25 = math.exp %24 : vector<8x8xf32>
    %cst_15 = arith.constant dense<0.000000e+00> : vector<8xf32>
    %26 = vector.multi_reduction <add>, %25, %cst_15 [1] : vector<8x8xf32> to vector<8xf32>
    %27 = vector.shape_cast %26 : vector<8xf32> to vector<8x1xf32>
    %28 = tpu.reciprocal %27 {approx = true} : vector<8x1xf32> -> vector<8x1xf32>
    %29 = vector.broadcast %28 : vector<8x1xf32> to vector<8x8xf32>
    %30 = arith.mulf %25, %29 : vector<8x8xf32>
    %31 = arith.truncf %30 : vector<8x8xf32> to vector<8x8xbf16>
    %cst_16 = arith.constant dense<0.000000e+00> : vector<8x8xf32>
    %32 = tpu.matmul %31, %17, %cst_16 {dimension_numbers = #tpu.dot_dimension_numbers<[1], [0], [0], [1], [0, 0, 1, 1], [], []>} : vector<8x8xbf16>, vector<8x8xbf16>, vector<8x8xf32> -> vector<8x8xf32>
    %33 = arith.truncf %32 : vector<8x8xf32> to vector<8x8xbf16>
    %c0_17 = arith.constant 0 : index
    %c0_18 = arith.constant 0 : index
    %34 = vector.load %arg11[%c0_17, %c0_18] : memref<8x32xbf16, #tpu.memory_space<vmem>>, vector<8x8xbf16>
    tpu.vector_store %arg11[%c0_17, %c0_18], %33 {strides = array<i32>} : memref<8x32xbf16, #tpu.memory_space<vmem>>, vector<8x8xbf16>,
    %c0_19 = arith.constant 0 : index
    %c0_20 = arith.constant 0 : index
    %35 = vector.load %arg12[%c0_19, %c0_20] : memref<8x8xf32, #tpu.memory_space<vmem>>, vector<8x8xf32>
    tpu.vector_store %arg12[%c0_19, %c0_20], %30 {strides = array<i32>} : memref<8x8xf32, #tpu.memory_space<vmem>>, vector<8x8xf32>,
    %36 = vector.extract_strided_slice %9 {offsets = [0, 8], sizes = [8, 8], strides = [1, 1]} : vector<8x32xf32> to vector<8x8xf32>
    %37 = arith.truncf %36 : vector<8x8xf32> to vector<8x8xbf16>
    %38 = vector.extract_strided_slice %11 {offsets = [0, 8], sizes = [8, 8], strides = [1, 1]} : vector<8x32xbf16> to vector<8x8xbf16>
    %39 = vector.extract_strided_slice %13 {offsets = [0, 8], sizes = [8, 8], strides = [1, 1]} : vector<8x32xbf16> to vector<8x8xbf16>
    %cst_21 = arith.constant dense<0.000000e+00> : vector<8x8xf32>
    %40 = tpu.matmul %37, %38, %cst_21 {dimension_numbers = #tpu.dot_dimension_numbers<[1], [1], [0], [0], [0, 0, 1, 0], [], []>} : vector<8x8xbf16>, vector<8x8xbf16>, vector<8x8xf32> -> vector<8x8xf32>
    %cst_22 = arith.constant 0.353553385 : f32
    %41 = vector.broadcast %cst_22 : f32 to vector<8x8xf32>
    %42 = arith.mulf %40, %41 : vector<8x8xf32>
    %cst_23 = arith.constant dense<0xFF800000> : vector<8xf32>
    %43 = vector.multi_reduction <maximumf>, %42, %cst_23 [1] : vector<8x8xf32> to vector<8xf32>
    %44 = vector.shape_cast %43 : vector<8xf32> to vector<8x1xf32>
    %45 = vector.broadcast %44 : vector<8x1xf32> to vector<8x8xf32>
    %46 = arith.subf %42, %45 : vector<8x8xf32>
    %47 = math.exp %46 : vector<8x8xf32>
    %cst_24 = arith.constant dense<0.000000e+00> : vector<8xf32>
    %48 = vector.multi_reduction <add>, %47, %cst_24 [1] : vector<8x8xf32> to vector<8xf32>
    %49 = vector.shape_cast %48 : vector<8xf32> to vector<8x1xf32>
    %50 = tpu.reciprocal %49 {approx = true} : vector<8x1xf32> -> vector<8x1xf32>
    %51 = vector.broadcast %50 : vector<8x1xf32> to vector<8x8xf32>
    %52 = arith.mulf %47, %51 : vector<8x8xf32>
    %53 = arith.truncf %52 : vector<8x8xf32> to vector<8x8xbf16>
    %cst_25 = arith.constant dense<0.000000e+00> : vector<8x8xf32>
    %54 = tpu.matmul %53, %39, %cst_25 {dimension_numbers = #tpu.dot_dimension_numbers<[1], [0], [0], [1], [0, 0, 1, 1], [], []>} : vector<8x8xbf16>, vector<8x8xbf16>, vector<8x8xf32> -> vector<8x8xf32>
    %55 = arith.truncf %54 : vector<8x8xf32> to vector<8x8xbf16>
    %c0_26 = arith.constant 0 : index
    %c8 = arith.constant 8 : index
    %56 = vector.load %arg11[%c0_26, %c8] : memref<8x32xbf16, #tpu.memory_space<vmem>>, vector<8x8xbf16>
    tpu.vector_store %arg11[%c0_26, %c8], %55 {strides = array<i32>} : memref<8x32xbf16, #tpu.memory_space<vmem>>, vector<8x8xbf16>,
    %c0_27 = arith.constant 0 : index
    %c0_28 = arith.constant 0 : index
    %57 = vector.load %arg12[%c0_27, %c0_28] : memref<8x8xf32, #tpu.memory_space<vmem>>, vector<8x8xf32>
    %58 = arith.addf %57, %52 : vector<8x8xf32>
    %c0_29 = arith.constant 0 : index
    %c0_30 = arith.constant 0 : index
    %59 = vector.load %arg12[%c0_29, %c0_30] : memref<8x8xf32, #tpu.memory_space<vmem>>, vector<8x8xf32>
    tpu.vector_store %arg12[%c0_29, %c0_30], %58 {strides = array<i32>} : memref<8x8xf32, #tpu.memory_space<vmem>>, vector<8x8xf32>,
    %60 = vector.extract_strided_slice %9 {offsets = [0, 16], sizes = [8, 8], strides = [1, 1]} : vector<8x32xf32> to vector<8x8xf32>
    %61 = arith.truncf %60 : vector<8x8xf32> to vector<8x8xbf16>
    %62 = vector.extract_strided_slice %11 {offsets = [0, 16], sizes = [8, 8], strides = [1, 1]} : vector<8x32xbf16> to vector<8x8xbf16>
    %63 = vector.extract_strided_slice %13 {offsets = [0, 16], sizes = [8, 8], strides = [1, 1]} : vector<8x32xbf16> to vector<8x8xbf16>
    %cst_31 = arith.constant dense<0.000000e+00> : vector<8x8xf32>
    %64 = tpu.matmul %61, %62, %cst_31 {dimension_numbers = #tpu.dot_dimension_numbers<[1], [1], [0], [0], [0, 0, 1, 0], [], []>} : vector<8x8xbf16>, vector<8x8xbf16>, vector<8x8xf32> -> vector<8x8xf32>
    %cst_32 = arith.constant 0.353553385 : f32
    %65 = vector.broadcast %cst_32 : f32 to vector<8x8xf32>
    %66 = arith.mulf %64, %65 : vector<8x8xf32>
    %cst_33 = arith.constant dense<0xFF800000> : vector<8xf32>
    %67 = vector.multi_reduction <maximumf>, %66, %cst_33 [1] : vector<8x8xf32> to vector<8xf32>
    %68 = vector.shape_cast %67 : vector<8xf32> to vector<8x1xf32>
    %69 = vector.broadcast %68 : vector<8x1xf32> to vector<8x8xf32>
    %70 = arith.subf %66, %69 : vector<8x8xf32>
    %71 = math.exp %70 : vector<8x8xf32>
    %cst_34 = arith.constant dense<0.000000e+00> : vector<8xf32>
    %72 = vector.multi_reduction <add>, %71, %cst_34 [1] : vector<8x8xf32> to vector<8xf32>
    %73 = vector.shape_cast %72 : vector<8xf32> to vector<8x1xf32>
    %74 = tpu.reciprocal %73 {approx = true} : vector<8x1xf32> -> vector<8x1xf32>
    %75 = vector.broadcast %74 : vector<8x1xf32> to vector<8x8xf32>
    %76 = arith.mulf %71, %75 : vector<8x8xf32>
    %77 = arith.truncf %76 : vector<8x8xf32> to vector<8x8xbf16>
    %cst_35 = arith.constant dense<0.000000e+00> : vector<8x8xf32>
    %78 = tpu.matmul %77, %63, %cst_35 {dimension_numbers = #tpu.dot_dimension_numbers<[1], [0], [0], [1], [0, 0, 1, 1], [], []>} : vector<8x8xbf16>, vector<8x8xbf16>, vector<8x8xf32> -> vector<8x8xf32>
    %79 = arith.truncf %78 : vector<8x8xf32> to vector<8x8xbf16>
    %c0_36 = arith.constant 0 : index
    %c16 = arith.constant 16 : index
    %80 = vector.load %arg11[%c0_36, %c16] : memref<8x32xbf16, #tpu.memory_space<vmem>>, vector<8x8xbf16>
    tpu.vector_store %arg11[%c0_36, %c16], %79 {strides = array<i32>} : memref<8x32xbf16, #tpu.memory_space<vmem>>, vector<8x8xbf16>,
    %c0_37 = arith.constant 0 : index
    %c0_38 = arith.constant 0 : index
    %81 = vector.load %arg12[%c0_37, %c0_38] : memref<8x8xf32, #tpu.memory_space<vmem>>, vector<8x8xf32>
    %82 = arith.addf %81, %76 : vector<8x8xf32>
    %c0_39 = arith.constant 0 : index
    %c0_40 = arith.constant 0 : index
    %83 = vector.load %arg12[%c0_39, %c0_40] : memref<8x8xf32, #tpu.memory_space<vmem>>, vector<8x8xf32>
    tpu.vector_store %arg12[%c0_39, %c0_40], %82 {strides = array<i32>} : memref<8x8xf32, #tpu.memory_space<vmem>>, vector<8x8xf32>,
    %84 = vector.extract_strided_slice %9 {offsets = [0, 24], sizes = [8, 8], strides = [1, 1]} : vector<8x32xf32> to vector<8x8xf32>
    %85 = arith.truncf %84 : vector<8x8xf32> to vector<8x8xbf16>
    %86 = vector.extract_strided_slice %11 {offsets = [0, 24], sizes = [8, 8], strides = [1, 1]} : vector<8x32xbf16> to vector<8x8xbf16>
    %87 = vector.extract_strided_slice %13 {offsets = [0, 24], sizes = [8, 8], strides = [1, 1]} : vector<8x32xbf16> to vector<8x8xbf16>
    %cst_41 = arith.constant dense<0.000000e+00> : vector<8x8xf32>
    %88 = tpu.matmul %85, %86, %cst_41 {dimension_numbers = #tpu.dot_dimension_numbers<[1], [1], [0], [0], [0, 0, 1, 0], [], []>} : vector<8x8xbf16>, vector<8x8xbf16>, vector<8x8xf32> -> vector<8x8xf32>
    %cst_42 = arith.constant 0.353553385 : f32
    %89 = vector.broadcast %cst_42 : f32 to vector<8x8xf32>
    %90 = arith.mulf %88, %89 : vector<8x8xf32>
    %cst_43 = arith.constant dense<0xFF800000> : vector<8xf32>
    %91 = vector.multi_reduction <maximumf>, %90, %cst_43 [1] : vector<8x8xf32> to vector<8xf32>
    %92 = vector.shape_cast %91 : vector<8xf32> to vector<8x1xf32>
    %93 = vector.broadcast %92 : vector<8x1xf32> to vector<8x8xf32>
    %94 = arith.subf %90, %93 : vector<8x8xf32>
    %95 = math.exp %94 : vector<8x8xf32>
    %cst_44 = arith.constant dense<0.000000e+00> : vector<8xf32>
    %96 = vector.multi_reduction <add>, %95, %cst_44 [1] : vector<8x8xf32> to vector<8xf32>
    %97 = vector.shape_cast %96 : vector<8xf32> to vector<8x1xf32>
    %98 = tpu.reciprocal %97 {approx = true} : vector<8x1xf32> -> vector<8x1xf32>
    %99 = vector.broadcast %98 : vector<8x1xf32> to vector<8x8xf32>
    %100 = arith.mulf %95, %99 : vector<8x8xf32>
    %101 = arith.truncf %100 : vector<8x8xf32> to vector<8x8xbf16>
    %cst_45 = arith.constant dense<0.000000e+00> : vector<8x8xf32>
    %102 = tpu.matmul %101, %87, %cst_45 {dimension_numbers = #tpu.dot_dimension_numbers<[1], [0], [0], [1], [0, 0, 1, 1], [], []>} : vector<8x8xbf16>, vector<8x8xbf16>, vector<8x8xf32> -> vector<8x8xf32>
    %103 = arith.truncf %102 : vector<8x8xf32> to vector<8x8xbf16>
    %c0_46 = arith.constant 0 : index
    %c24 = arith.constant 24 : index
    %104 = vector.load %arg11[%c0_46, %c24] : memref<8x32xbf16, #tpu.memory_space<vmem>>, vector<8x8xbf16>
    tpu.vector_store %arg11[%c0_46, %c24], %103 {strides = array<i32>} : memref<8x32xbf16, #tpu.memory_space<vmem>>, vector<8x8xbf16>,
    %c0_47 = arith.constant 0 : index
    %c0_48 = arith.constant 0 : index
    %105 = vector.load %arg12[%c0_47, %c0_48] : memref<8x8xf32, #tpu.memory_space<vmem>>, vector<8x8xf32>
    %106 = arith.addf %105, %100 : vector<8x8xf32>
    %c0_49 = arith.constant 0 : index
    %c0_50 = arith.constant 0 : index
    %107 = vector.load %arg12[%c0_49, %c0_50] : memref<8x8xf32, #tpu.memory_space<vmem>>, vector<8x8xf32>
    tpu.vector_store %arg12[%c0_49, %c0_50], %106 {strides = array<i32>} : memref<8x8xf32, #tpu.memory_space<vmem>>, vector<8x8xf32>,
    %c0_51 = arith.constant 0 : index
    %c0_52 = arith.constant 0 : index
    %108 = vector.load %arg11[%c0_51, %c0_52] : memref<8x32xbf16, #tpu.memory_space<vmem>>, vector<8x32xbf16>
    %c0_53 = arith.constant 0 : index
    %c0_54 = arith.constant 0 : index
    %109 = vector.load %arg7[%c0_53, %c0_54] : memref<32x32xbf16, #tpu.memory_space<vmem>>, vector<32x32xbf16>
    %cst_55 = arith.constant dense<0.000000e+00> : vector<8x32xf32>
    %110 = tpu.matmul %108, %109, %cst_55 {dimension_numbers = #tpu.dot_dimension_numbers<[1], [0], [0], [1], [0, 0, 1, 1], [], []>} : vector<8x32xbf16>, vector<32x32xbf16>, vector<8x32xf32> -> vector<8x32xf32>
    %c0_56 = arith.constant 0 : index
    %c0_57 = arith.constant 0 : index
    %111 = vector.load %arg8[%c0_56, %c0_57] : memref<1x32xf32, #tpu.memory_space<vmem>>, vector<1x32xf32>
    %112 = vector.shape_cast %111 : vector<1x32xf32> to vector<32xf32>
    %113 = vector.shape_cast %112 : vector<32xf32> to vector<1x32xf32>
    %114 = vector.broadcast %113 : vector<1x32xf32> to vector<8x32xf32>
    %115 = arith.addf %110, %114 : vector<8x32xf32>
    %c0_58 = arith.constant 0 : index
    %c0_59 = arith.constant 0 : index
    %c0_60 = arith.constant 0 : index
    %116 = vector.load %arg9[%c0_58, %c0_59, %c0_60] : memref<1x8x32xf32, #tpu.memory_space<vmem>>, vector<1x8x32xf32>
    %117 = vector.shape_cast %116 : vector<1x8x32xf32> to vector<8x32xf32>
    %118 = vector.shape_cast %115 : vector<8x32xf32> to vector<1x8x32xf32>
    tpu.vector_store %arg9[%c0_58, %c0_59, %c0_60], %118 {strides = array<i32>} : memref<1x8x32xf32, #tpu.memory_space<vmem>>, vector<1x8x32xf32>,
    %c0_61 = arith.constant 0 : index
    %c0_62 = arith.constant 0 : index
    %119 = vector.load %arg12[%c0_61, %c0_62] : memref<8x8xf32, #tpu.memory_space<vmem>>, vector<8x8xf32>
    %cst_63 = arith.constant 2.500000e-01 : f32
    %120 = vector.broadcast %cst_63 : f32 to vector<8x8xf32>
    %121 = arith.mulf %119, %120 : vector<8x8xf32>
    %c0_64 = arith.constant 0 : index
    %c0_65 = arith.constant 0 : index
    %c0_66 = arith.constant 0 : index
    %122 = vector.load %arg10[%c0_64, %c0_65, %c0_66] : memref<1x8x8xf32, #tpu.memory_space<vmem>>, vector<1x8x8xf32>
    %123 = vector.shape_cast %122 : vector<1x8x8xf32> to vector<8x8xf32>
    %124 = vector.shape_cast %121 : vector<8x8xf32> to vector<1x8x8xf32>
    tpu.vector_store %arg10[%c0_64, %c0_65, %c0_66], %124 {strides = array<i32>} : memref<1x8x8xf32, #tpu.memory_space<vmem>>, vector<1x8x8xf32>,
    return
  }
  func.func @transform_0(%arg0: i32, %arg1: i32) -> (i32, i32, i32) {
    %c0_i32 = arith.constant 0 : i32
    %c0_i32_0 = arith.constant 0 : i32
    return %arg0, %arg1, %c0_i32 : i32, i32, i32
  }
  func.func @transform_1(%arg0: i32, %arg1: i32) -> (i32, i32, i32) {
    %c0_i32 = arith.constant 0 : i32
    %c0_i32_0 = arith.constant 0 : i32
    %c0_i32_1 = arith.constant 0 : i32
    return %arg0, %c0_i32, %c0_i32_0 : i32, i32, i32
  }
  func.func @transform_2(%arg0: i32, %arg1: i32) -> (i32, i32, i32) {
    %c0_i32 = arith.constant 0 : i32
    %c0_i32_0 = arith.constant 0 : i32
    %c0_i32_1 = arith.constant 0 : i32
    return %arg0, %c0_i32, %c0_i32_0 : i32, i32, i32
  }
  func.func @transform_3(%arg0: i32, %arg1: i32) -> (i32, i32) {
    %c0_i32 = arith.constant 0 : i32
    %c0_i32_0 = arith.constant 0 : i32
    %c0_i32_1 = arith.constant 0 : i32
    return %c0_i32, %c0_i32_0 : i32, i32
  }
  func.func @transform_4(%arg0: i32, %arg1: i32) -> (i32, i32) {
    %c0_i32 = arith.constant 0 : i32
    %c0_i32_0 = arith.constant 0 : i32
    %c0_i32_1 = arith.constant 0 : i32
    return %c0_i32, %c0_i32_0 : i32, i32
  }
  func.func @transform_5(%arg0: i32, %arg1: i32) -> (i32, i32) {
    %c0_i32 = arith.constant 0 : i32
    %c0_i32_0 = arith.constant 0 : i32
    %c0_i32_1 = arith.constant 0 : i32
    return %c0_i32, %c0_i32_0 : i32, i32
  }
  func.func @transform_6(%arg0: i32, %arg1: i32) -> (i32, i32) {
    %c0_i32 = arith.constant 0 : i32
    %c0_i32_0 = arith.constant 0 : i32
    %c0_i32_1 = arith.constant 0 : i32
    return %c0_i32, %c0_i32_0 : i32, i32
  }
  func.func @transform_7(%arg0: i32, %arg1: i32) -> (i32, i32, i32) {
    %c0_i32 = arith.constant 0 : i32
    %c0_i32_0 = arith.constant 0 : i32
    return %arg0, %arg1, %c0_i32 : i32, i32, i32
  }
  func.func @transform_8(%arg0: i32, %arg1: i32) -> (i32, i32, i32) {
    %c0_i32 = arith.constant 0 : i32
    %c0_i32_0 = arith.constant 0 : i32
    return %arg0, %arg1, %c0_i32 : i32, i32, i32
  }
}

</mosaic_0001>

<bundles_post_ra>
// kernel: tpu_custom_call.1
= control target key start
LH: loop header
LB: loop body
LE: loop exit
PB: predicated region body
PF: predicated region fallthrough
CT: control target
= control target key end

     0   :  { %s2183_s0 = inlined_call_operand.hbm [shape: f32[2,8,32], index: 0, kind: input, shape index: {}]   ;;  %s2184_s1 = inlined_call_operand.hbm [shape: bf16[2,8,32], index: 1, kind: input, shape index: {}]   ;;  %s2185_s2 = inlined_call_operand.hbm [shape: bf16[2,8,32], index: 2, kind: input, shape index: {}]   ;;  %s2186_s3 = inlined_call_operand.hbm [shape: bf16[32,32], index: 3, kind: input, shape index: {}]   ;;  %s2187_s4 = inlined_call_operand.vmem [shape: f32[1,32], index: 4, kind: input, shape index: {}]   ;;  %s2188_s5 = inlined_call_operand.vmem [shape: bf16[32,32], index: 5, kind: input, shape index: {}]   ;;  %s2189_s6 = inlined_call_operand.vmem [shape: f32[1,32], index: 6, kind: input, shape index: {}]   ;;  %s2190_s7 = inlined_call_operand.hbm [shape: f32[2,8,32], index: 7, kind: output, shape index: {0}]   ;;  %s2191_s8 = inlined_call_operand.hbm [shape: f32[2,8,8], index: 8, kind: output, shape index: {1}]  }
   0x1   :  { %2200 = sst [smem:[#allocation21_spill]] %s2184_s1 }
   0x2   :  { %14 = vsyncpa [#allocation5], 0 }
   0x3   :  { %16 = vsyncpa [#allocation5 + $0x1], 0 }
   0x4   :  { %17 = vsyncpa [#allocation8], 0 }
   0x5   :  { %18 = vsyncpa [#allocation11], 0 }
   0x6   :  { %19 = vsyncpa [#allocation6], 0 }
   0x7   :  { %21 = vsyncpa [#allocation6 + $0x1], 0 }
   0x8   :  { %22 = vsyncpa [#allocation14], 0 }
   0x9   :  { %24 = vsyncpa [#allocation14 + $0x1], 0  ;;  %s1771_s27 = smov 0   ;;  %s1773_s28 = smov 0  }
   0xa   :  { %s1775_s29 = smov 0   ;;  %s1777_s30 = smov 0  }
   0xb   :  { %s1779_s9 = smov 0   ;;  %s1781_s10 = smov 0  }
   0xc LB: > { %s1216_s11 = sadd.s32 4294967295, %s1708_s10   ;;  %s1217_s12 = sadd.s32 4294967294, %s1708_s10   ;;  %s1708_s10 = sphi %s1781_s10, %s30_s10   ;;  %s1704_s9 = sphi %s1779_s9, %s2226_s9   ;;  %s1700_s30 = sphi %s1777_s30, %s2225_s30   ;;  %s1696_s29 = sphi %s1775_s29, %s2224_s29   ;;  %s1692_s28 = sphi %s1773_s28, %s2223_s28   ;;  %s1688_s27 = sphi %s1771_s27, %s2222_s27  }
   0xd   : > { %p64_p0 = scmp.ne.s32.totalorder %s1692_s28, %s1688_s27  ;;  %p1805_p1 = scmp.eq.s32.totalorder %s1216_s11, 0 }
   0xe   : > { %p1809_p2 = scmp.eq.s32.totalorder %s1216_s11, 1  ;;  %p232_p3 = scmp.eq.s32.totalorder %s1217_s12, 1 }
   0xf   : > { %s2201_s13 = scalar_select %p1805_p1, 1, 0 }
  0x10   : > { %s2202_s14 = scalar_select %p1809_p2, 1, 0 }
  0x11   : > { %p1815_p4 = por %p1805_p1, %p64_p0  ;;  %p1218_p5 = scmp.ge.s32.totalorder %s1708_s10, 1 }
  0x12   : > { %p1820_p6 = por %p232_p3, %p64_p0  ;;  %p267_p7 = scmp.lt.s32.totalorder %s1708_s10, 3 }
  0x13   : > { %s2203_s15 = scalar_select %p1815_p4, 1, 0 }
  0x14   : > { %s2204_s16 = scalar_select %p1820_p6, 1, 0 }
  0x15   : > { %s1219_s17 = sshll.u32 %s1700_s30, 6  ;;  %p1826_p8 = pnand %p1218_p5, %p267_p7 }
  0x16   : > { %2205 = sst [smem:[#allocation20_spill]] %s2204_s16  ;;  %s2207_s1 = sld [smem:[#allocation21_spill]] }
  0x17   : > { %s2206_s18 = scalar_select %p1826_p8, 1, 0 }
  0x18   : > { %s1710_s22 = smov [#allocation7]   ;;  %p2193_p9 = pneg %p1826_p8 }
  0x19   : > { %s282_s23 = sshll.u32 %s1710_s22, 4  ;;  %s1843_s26 = scalar_lea.hbm %s2185_s2, %s1219_s17  ;;  %s1837_s23 = int_to_ptr.vmem [resolvable:$true] %s282_s23 }
  0x1a   : > { %p1850_p11 = pnand %p2193_p9, %p1815_p4  ;;  %s1711_s12 = smov [#allocation9]  }
  0x1b   : > { %s295_s19 = sshll.u32 %s1711_s12, 4  ;;  %s1854_s19 = int_to_ptr.vmem [resolvable:$true] %s295_s19 }
  0x1c   : > { %s1833_s21 = scalar_lea.hbm %s2207_s1, %s1219_s17  ;;  %p1470_p13 = pneg %p1850_p11 }
  0x1d   : > { %s1468_s20 = scalar_lea.hbm %s1833_s21, 64  ;;  %s1473_s24 = scalar_lea.hbm %s2207_s1, 128 }
  0x1e   : > { %p1469_p12 = scmp.ne.s32.totalorder %s1833_s21, %s1468_s20  ;;  %p1474_p5 = scmp.lt.u32.totalorder %s1833_s21, %s2207_s1 }
  0x1f   : > { %p1475_p7 = scmp.lt.u32.totalorder %s1473_s24, %s1468_s20  ;;  %p1477_p9 = scmp.lt.u32.totalorder %s1468_s20, %s1833_s21 }
  0x20   : > { %p1471_p0 = pnand %p1470_p13, %p1469_p12 }
  0x21   : > { %p1476_p10 = por %p1475_p7, %p1474_p5 }
  0x22   : > { %p1472_p3 = pneg %p1471_p0 }
  0x23   : > { %p1478_p6 = por %p1477_p9, %p1476_p10 }
  0x25   : > { %p1479_p4 = pnand %p1478_p6, %p1472_p3 }
  0x27   : > { %1482 = shalt.err (!%p1479_p4)
}
  0x28   : > { %s1483_s12 = scalar_lea.vmem %s1837_s23, 64  ;;  %p1491_p8 = scmp.lt.s32.totalorder %s1837_s23, %s1837_s23 }
  0x29   : > { %p1484_p12 = scmp.ne.s32.totalorder %s1837_s23, %s1483_s12  ;;  %p1492_p1 = scmp.lt.s32.totalorder %s1483_s12, %s1483_s12 }
  0x2b   : > { %p1486_p0 = pnand %p1484_p12, %p1470_p13  ;;  %p1493_p5 = por %p1492_p1, %p1491_p8 }
  0x2d   : > { %p1487_p2 = pneg %p1486_p0 }
  0x2f   : > { %p1494_p7 = pnand %p1493_p5, %p1487_p2 }
  0x31   : > { %1497 = shalt.err (!%p1494_p7)
}
  0x32   : > { %1363 = dma.hbm_to_vmem [thread:$0]  (!%p1850_p11), %s1833_s21, 64, %s1837_s23, [#allocation8]  }
  0x33   : > { %s1498_s16 = scalar_lea.hbm %s1843_s26, 64  ;;  %s1503_s22 = scalar_lea.hbm %s2185_s2, 128 }
  0x34   : > { %p1499_p4 = scmp.ne.s32.totalorder %s1843_s26, %s1498_s16  ;;  %p1504_p1 = scmp.lt.u32.totalorder %s1843_s26, %s2185_s2 }
  0x35   : > { %p1505_p2 = scmp.lt.u32.totalorder %s1503_s22, %s1498_s16  ;;  %p1507_p10 = scmp.lt.u32.totalorder %s1498_s16, %s1843_s26 }
  0x36   : > { %p1501_p6 = pnand %p1499_p4, %p1470_p13 }
  0x37   : > { %p1506_p8 = por %p1505_p2, %p1504_p1 }
  0x38   : > { %p1502_p9 = pneg %p1501_p6 }
  0x39   : > { %p1508_p3 = por %p1507_p10, %p1506_p8 }
  0x3b   : > { %p1509_p12 = pnand %p1508_p3, %p1502_p9 }
  0x3d   : > { %1512 = shalt.err (!%p1509_p12)
}
  0x3e   : > { %s1513_s21 = scalar_lea.vmem %s1854_s19, 64  ;;  %p1521_p4 = scmp.lt.s32.totalorder %s1854_s19, %s1854_s19 }
  0x3f   : > { %p1514_p0 = scmp.ne.s32.totalorder %s1854_s19, %s1513_s21  ;;  %p1522_p6 = scmp.lt.s32.totalorder %s1513_s21, %s1513_s21 }
  0x41   : > { %p1516_p5 = pnand %p1514_p0, %p1470_p13  ;;  %p1523_p1 = por %p1522_p6, %p1521_p4 }
  0x43   : > { %p1517_p7 = pneg %p1516_p5 }
  0x45   : > { %p1524_p2 = pnand %p1523_p1, %p1517_p7 }
  0x47   : > { %1527 = shalt.err (!%p1524_p2)
}
  0x48   : > { %1366 = dma.hbm_to_vmem [thread:$0]  (!%p1850_p11), %s1843_s26, 64, %s1854_s19, [#allocation8]  }
  0x49   : > { %s1712_s23 = smov [#allocation10]   ;;  %p2209_p9 = scmp.ne.s32.totalorder %s2201_s13, 0 }
  0x4a   : > { %s305_s12 = sshll.u32 %s1712_s23, 4  ;;  %p2210_p8 = scmp.ne.s32.totalorder %s2206_s18, 0  ;;  %s306_s12 = int_to_ptr.vmem [resolvable:$true] %s305_s12 }
  0x4b   : > { %s1528_s11 = scalar_lea.hbm %s2186_s3, 256 }
  0x4c   : > { %p2211_p10 = pneg %p2210_p8  ;;  %p1529_p3 = scmp.ne.s32.totalorder %s2186_s3, %s1528_s11 }
  0x4d   : > { %p1535_p5 = scmp.lt.u32.totalorder %s1528_s11, %s2186_s3 }
  0x4e   : > { %p1911_p13 = pnand %p2211_p10, %p2209_p9 }
  0x50   : > { %p1530_p11 = pneg %p1911_p13 }
  0x52   : > { %p1531_p12 = pnand %p1530_p11, %p1529_p3 }
  0x54   : > { %p1532_p0 = pneg %p1531_p12 }
  0x56   : > { %p1537_p7 = pnand %p1535_p5, %p1532_p0 }
  0x58   : > { %1540 = shalt.err (!%p1537_p7)
}
  0x59   : > { %s1541_s25 = scalar_lea.vmem %s306_s12, 256  ;;  %p1549_p2 = scmp.lt.s32.totalorder %s306_s12, %s306_s12 }
  0x5a   : > { %p1542_p4 = scmp.ne.s32.totalorder %s306_s12, %s1541_s25  ;;  %p1550_p9 = scmp.lt.s32.totalorder %s1541_s25, %s1541_s25 }
  0x5c   : > { %p1544_p6 = pnand %p1542_p4, %p1530_p11  ;;  %p1551_p10 = por %p1550_p9, %p1549_p2 }
  0x5e   : > { %p1545_p1 = pneg %p1544_p6 }
  0x60   : > { %p1552_p8 = pnand %p1551_p10, %p1545_p1 }
  0x62   : > { %1555 = shalt.err (!%p1552_p8)
}
  0x63   : > { %s1713_s21 = smov 64   ;;  %s1714_s23 = smov 4  }
  0x64   : > { %1369 = dma.hbm_to_vmem [thread:$0]  (!%p1911_p13), %s2186_s3, 256, %s306_s12, [#allocation11], %s1713_s21, %s1713_s21, %s1714_s23  }
  0x65   : > { %s42_s11 = sadd.s32 1, %s1704_s9  ;;  %s51_s22 = sadd.s32 1, %s1696_s29 }
  0x66   : > { %p44_p8 = scmp.ge.s32.totalorder %s42_s11, 2  ;;  %p58_p3 = scmp.ne.s32.totalorder %s1696_s29, %s1692_s28 }
  0x67   : > { %p59_p11 = scmp.eq.s32.totalorder %s1708_s10, 0  ;;  %p1382_p12 = scmp.lt.s32.totalorder %s1708_s10, 2 }
  0x68   : > { %s2228_s11 = smov (%p44_p8, %s42_s11), 0  ;;  %p2213_p5 = scmp.ne.s32.totalorder %s2202_s14, 0 }
  0x69   : > { %p60_p0 = por %p59_p11, %p58_p3  ;;  %s46_s16 = ssub.s32 %s1704_s9, %s2228_s11 }
  0x6a   : > { %p1941_p7 = por %p2213_p5, %p58_p3  ;;  %s328_s26 = sand.u32 1, %s1696_s29  }
  0x6b   : > { %p49_p4 = scmp.eq.s32.totalorder %s46_s16, 0  ;;  %s1223_s12 = sshll.u32 %s328_s26, 3 }
  0x6c   : > { %s1224_s19 = sshll.u32 %s1704_s9, 7  ;;  %s332_s14 = scalar_lea.vmem [#allocation4], %s1223_s12 }
  0x6d   : > { %s1950_s25 = scalar_select %p49_p4, %s1696_s29, %s51_s22  }
  0x6e   : > { %s1955_s20 = scalar_lea.hbm %s2183_s0, %s1224_s19  ;;  %s340_s17 = sshll.u32 %s332_s14, 4  ;;  %s1963_s17 = int_to_ptr.vmem [resolvable:$true] %s340_s17 }
  0x6f   : > { %p1959_p13 = pnand %p1382_p12, %p60_p0  ;;  %s329_s22 = scalar_lea.sflag [#allocation5], %s328_s26 }
  0x70   : > { %s1556_s16 = scalar_lea.hbm %s1955_s20, 128  ;;  %s1561_s21 = scalar_lea.hbm %s2183_s0, 256 }
  0x71   : > { %p1557_p6 = scmp.ne.s32.totalorder %s1955_s20, %s1556_s16  ;;  %p1558_p1 = pneg %p1959_p13 }
  0x72   : > { %p1562_p10 = scmp.lt.u32.totalorder %s1955_s20, %s2183_s0  ;;  %p1563_p8 = scmp.lt.u32.totalorder %s1561_s21, %s1556_s16 }
  0x73   : > { %p1559_p2 = pnand %p1558_p1, %p1557_p6  ;;  %p1565_p11 = scmp.lt.u32.totalorder %s1556_s16, %s1955_s20 }
  0x74   : > { %p1564_p3 = por %p1563_p8, %p1562_p10 }
  0x75   : > { %p1560_p9 = pneg %p1559_p2 }
  0x76   : > { %p1566_p12 = por %p1565_p11, %p1564_p3 }
  0x78   : > { %p1567_p0 = pnand %p1566_p12, %p1560_p9 }
  0x7a   : > { %1570 = shalt.err (!%p1567_p0)
}
  0x7b   : > { %s1571_s26 = scalar_lea.vmem %s1963_s17, 128  ;;  %s1715_s12 = smov [#allocation4]  }
  0x7c   : > { %p1572_p5 = scmp.ne.s32.totalorder %s1963_s17, %s1571_s26  ;;  %s1576_s19 = sshll.u32 %s1715_s12, 4  ;;  %s1577_s19 = int_to_ptr.vmem [resolvable:$false] %s1576_s19 }
  0x7d   : > { %s1578_s23 = scalar_lea.vmem %s1577_s19, 256  ;;  %p1579_p2 = scmp.lt.s32.totalorder %s1963_s17, %s1577_s19 }
  0x7e   : > { %p1574_p4 = pnand %p1572_p5, %p1558_p1  ;;  %p1580_p10 = scmp.lt.s32.totalorder %s1578_s23, %s1571_s26 }
  0x80   : > { %p1575_p6 = pneg %p1574_p4  ;;  %p1581_p8 = por %p1580_p10, %p1579_p2 }
  0x82   : > { %p1582_p3 = pnand %p1581_p8, %p1575_p6 }
  0x84   : > { %1585 = shalt.err (!%p1582_p3)
}
  0x85   : > { %1373 = dma.hbm_to_vmem [thread:$0]  (!%p1959_p13), %s1955_s20, 128, %s1963_s17, %s329_s22  }
  0x86   : > { %p2216_p9 = scmp.ne.s32.totalorder %s2206_s18, 0 }
  0x87   : > { %s1993_s16 = sand.u32 (!%p2216_p9), 1, %s1692_s28   ;;  %p2217_p1 = scmp.ne.s32.totalorder (!%p2216_p9), %s2203_s15, 0 }
  0x88   : > { %349 = sbr.rel (%p2216_p9) target bundleno = 1602 (0x642), region = 48  ;;  %s1996_s21 = sshll.u32 (!%p2216_p9), %s1993_s16, 3 }
  0x89   : > { %s352_s14 = scalar_lea.sflag (!%p2216_p9), [#allocation5], %s1993_s16  ;;  %s355_s26 = scalar_lea.vmem (!%p2216_p9), [#allocation4], %s1996_s21 }
  0x8f   : > { %1667 = dma.done.wait (%p2217_p1), %s352_s14, 128  }
  0x90   : > { %1669 = vsyncadd (%p2217_p1), %s352_s14, 4294967168 }
  0x91   : > { %1671 = dma.done.wait (%p2217_p1), [#allocation8], 128  }
  0x92   : > { %1673 = vsyncadd (%p2217_p1), [#allocation8], 4294967168  ;;  %p2218_p13 = scmp.ne.s32.totalorder %s2201_s13, 0 }
  0x94   : > { %1675 = dma.done.wait (%p2218_p13), [#allocation11], 256  }
  0x95   : > { %1677 = vsyncadd (%p2218_p13), [#allocation11], 4294967040  ;;  %v1716_v0 = vmov 0.0   ;;  %vm1717_vm0 = vmmov 0   ;;  %v1446_v1 = vld [vmem:[#allocation10] sm:$0xff]   ;;  %vm478_vm1 = vcmask 64512  }
  0x96   : > { %1282 = vmatprep.subr.bf16.mxu0 %v1716_v0  ;;  %1286 = vmatprep.mubr.msk.bf16.mxu0 %vm1717_vm0, %v1716_v0  ;;  %v1447_v2 = vld [vmem:[#allocation10 + $0x8] sm:$0xff]   ;;  %v475_v4 = vld [vmem:[#allocation7] sm:$0xf]  ;;  %s1718_s1 = smov 120   ;;  %vm431_vm2 = vcmask 261120   ;;  %s1719_s13 = smov 112  }
  0x97   : > { %1290 = vmatprep.subr.bf16.mxu1 %v1716_v0  ;;  %1292 = vmatprep.mubr.msk.bf16.mxu1 %vm1717_vm0, %v1716_v0  ;;  %v406_v3 = vld [vmem:[%s355_s26] sm:$0xff]  ;;  %v1236_v5 = vcombine.low %v475_v4, %v475_v4  ;;  %v483_v6 = vsel %vm478_vm1, %v475_v4, 0  ;;  %v1230_v8 = vld [vmem:[%s2187_s4] ss:$0 sm:$0xff]  ;;  %s1720_s20 = smov 104   ;;  %vm541_vm3 = vcmask 1043456  }
  0x98   : > { %1283 = vmatpush3.bf16.msra.mxu0 %v1446_v1  ;;  %1291 = vmatpush3.bf16.xpose.msra.mxu1 %v483_v6  ;;  %v407_v7 = vpack.c.bf16 %v406_v3, %v406_v3  ;;  %v476_v53 = vld [vmem:[#allocation9] sm:$0xf]  ;;  %s404_s17 = scalar_lea.vmem [#allocation13], %s1996_s21  ;;  %vm586_vm4 = vcmask 60416   ;;  %s1721_s22 = smov 8   ;;  %vm714_vm5 = vcmask 126016  }
  0x99   : > { %1284 = vmatprep.subr.bf16.mxu0 %v1716_v0  ;;  %595 = vrot.lane.b32.xlu0 %v1236_v5, %s1718_s1  ;;  %v1238_v54 = vcombine.low %v476_v53, %v476_v53  ;;  %v543_v55 = vsel %vm541_vm3, %v476_v53, 0  ;;  %s1722_s26 = smov 16   ;;  %vm837_vm6 = vcmask 191616   ;;  %vm960_vm7 = vcmask 257216   ;;  %s1042_s12 = scalar_lea.sflag [#allocation14], %s1993_s16 }
  0x9a   : > { %1302 = vmatprep.subr.bf16.mxu1 %v1716_v0  ;;  %721 = vrot.lane.b32.xlu1 %v1236_v5, %s1719_s13  ;;  %s1724_s23 = smov [#allocation13]  }
  0x9b   : > { %s1590_s14 = sshll.u32 %s1724_s23, 4  ;;  %s1591_s14 = int_to_ptr.vmem [resolvable:$false] %s1590_s14 }
  0x9c   : > { %1285 = vmatpush3.bf16.msra.mxu0 %v1447_v2 }
  0x9d   : > { %1296 = vmatprep.subr.bf16.mxu0 %v1716_v0 }
  0x9f   : > { %1287 = vmatmul.mubr.msk.bf16.vlgmr.msra.gmra.mrb[0].mxu0 %vm431_vm2, %v407_v7 }
  0xa0   : > { %1298 = vmatprep.mubr.msk.bf16.mxu0 %vm1717_vm0, %v1716_v0  ;;  %1297 = vmatpush3.bf16.msra.mxu0 %v543_v55 }
  0xa1   : > { %1308 = vmatprep.subr.bf16.mxu0 %v1716_v0 }
 0x10b   : > { %v596_v12 = vpop.permute.xlu0 %595 }
 0x10c   : > { %v601_v16 = vsel %vm478_vm1, %v596_v12, 0  ;;  %v722_v17 = vpop.permute.xlu1 %721 }
 0x10d   : > { %v727_v18 = vsel %vm478_vm1, %v722_v17, 0 }
 0x172   : > { %v469_v9 = vpop.f32.mrb[0].mxu0 }
 0x173   : > { %v470_v10 = vadd.f32 %v1230_v8, %v469_v9  ;;  %v1288_v11 = vpop.f32.mrb[1].mxu0 }
 0x174   : > { %v472_v13 = vpop.f32.mrb[2].mxu0 }
 0x175   : > { %v477_v14 = vpack.c.bf16 %v470_v10, %v470_v10  ;;  %v1289_v15 = vpop.f32.mrb[3].mxu0 }
 0x177   : > { %719 = vrot.lane.b32.xlu1 %v477_v14, %s1719_s13  ;;  %590 = vrot.lane.b32.xlu0 %v477_v14, %s1718_s1 }
 0x178   : > { %1293 = vmatmul.mubr.msk.bf16.vlgmr.msra.gmra.mrb[0].mxu1 %vm478_vm1, %v477_v14 }
 0x179   : > { %1303 = vmatpush3.bf16.xpose.msra.mxu1 %v601_v16  ;;  %1304 = vmatprep.mubr.msk.bf16.mxu1 %vm1717_vm0, %v1716_v0 }
 0x17a   : > { %1314 = vmatprep.subr.bf16.mxu1 %v1716_v0 }
 0x17b   : > { %842 = vrot.lane.b32.xlu1 %v477_v14, %s1720_s20  ;;  %844 = vrot.lane.b32.xlu0 %v1236_v5, %s1720_s20 }
 0x1e9   : > { %v591_v19 = vpop.permute.xlu0 %590  ;;  %v720_v22 = vpop.permute.xlu1 %719 }
 0x1ea   : > { %1305 = vmatmul.mubr.msk.bf16.vlgmr.msra.gmra.mrb[4].mxu1 %vm478_vm1, %v591_v19 }
 0x1eb   : > { %1315 = vmatpush3.bf16.xpose.msra.mxu1 %v727_v18  ;;  %1316 = vmatprep.mubr.msk.bf16.mxu1 %vm1717_vm0, %v1716_v0 }
 0x1ec   : > { %1326 = vmatprep.subr.bf16.mxu1 %v1716_v0 }
 0x1ed   : > { %v845_v20 = vpop.permute.xlu0 %844  ;;  %v843_v23 = vpop.permute.xlu1 %842 }
 0x1ee   : > { %v850_v21 = vsel %vm478_vm1, %v845_v20, 0 }
 0x1f2   : > { %1317 = vmatmul.mubr.msk.bf16.vlgmr.msra.gmra.mrb[8].mxu1 %vm478_vm1, %v720_v22 }
 0x1f3   : > { %1327 = vmatpush3.bf16.xpose.msra.mxu1 %v850_v21  ;;  %1328 = vmatprep.mubr.msk.bf16.mxu1 %vm1717_vm0, %v1716_v0 }
 0x1f4   : > { %1338 = vmatprep.subr.bf16.mxu1 %v1716_v0 }
 0x1fa   : > { %1329 = vmatmul.mubr.msk.bf16.vlgmr.msra.gmra.mrb[12].mxu1 %vm478_vm1, %v843_v23 }
 0x1fb   : > { %1342 = vmatprep.mubr.msk.bf16.mxu1 %vm1717_vm0, %v1716_v0 }
 0x24b   : > { %v519_v24 = vpop.f32.mrb[0].mxu1 }
 0x24c   : > { %v525_v25 = vmul.f32 0.35355338, %v519_v24  ;;  %v1294_v26 = vpop.f32.mrb[1].mxu1 }
 0x24d   : > { %v522_v27 = vpop.f32.mrb[2].mxu1 }
 0x24e   : > { %v1295_v28 = vpop.f32.mrb[3].mxu1  ;;  %v526_v29 = vsel %vm478_vm1, %v525_v25, -inf }
 0x24f   : > { %527 = vmax.xlane.f32.xlu0 %v526_v29 }
 0x2bd   : > { %v637_v30 = vpop.f32.mrb[4].mxu1 }
 0x2be   : > { %v643_v31 = vmul.f32 0.35355338, %v637_v30  ;;  %v1306_v32 = vpop.f32.mrb[5].mxu1 }
 0x2bf   : > { %v640_v33 = vpop.f32.mrb[6].mxu1 }
 0x2c0   : > { %v1307_v34 = vpop.f32.mrb[7].mxu1  ;;  %v644_v35 = vsel %vm478_vm1, %v643_v31, -inf }
 0x2c1   : > { %645 = vmax.xlane.f32.xlu1 %v644_v35 }
 0x2c5   : > { %v763_v36 = vpop.f32.mrb[8].mxu1 }
 0x2c6   : > { %v769_v37 = vmul.f32 0.35355338, %v763_v36  ;;  %v1318_v38 = vpop.f32.mrb[9].mxu1 }
 0x2c7   : > { %v766_v39 = vpop.f32.mrb[10].mxu1 }
 0x2c8   : > { %v1319_v40 = vpop.f32.mrb[11].mxu1  ;;  %v770_v41 = vsel %vm478_vm1, %v769_v37, -inf }
 0x2c9   : > { %771 = vmax.xlane.f32.xlu0 %v770_v41 }
 0x2cd   : > { %v886_v42 = vpop.f32.mrb[12].mxu1 }
 0x2ce   : > { %v892_v43 = vmul.f32 0.35355338, %v886_v42  ;;  %v1330_v44 = vpop.f32.mrb[13].mxu1 }
 0x2cf   : > { %v889_v45 = vpop.f32.mrb[14].mxu1 }
 0x2d0   : > { %v1331_v46 = vpop.f32.mrb[15].mxu1  ;;  %v893_v47 = vsel %vm478_vm1, %v892_v43, -inf }
 0x2d1   : > { %894 = vmax.xlane.f32.xlu0 %v893_v47 }
 0x2dc   : > { %v528_v48 = vpop.xlane.xlu0 %527 }
 0x2dd   : > { %v529_v49 = vsub.f32 %v525_v25, %v528_v48  ;;  %v1450_v48 = vld [vmem:[%s2188_s5] sm:$0xff]  }
 0x2de   : > { %1339 = vmatpush3.bf16.msra.mxu1 %v1450_v48 }
 0x2df   : > { %v530_v50 = vmul.f32 1.442695, %v529_v49  ;;  %1340 = vmatprep.subr.bf16.mxu1 %v1716_v0 }
 0x2e1   : > { %1452 = vpow2.f32 %v530_v50  ;;  %v1451_v50 = vld [vmem:[%s2188_s5 + $0x8] sm:$0xff]  }
 0x2e2   : > { %1341 = vmatpush3.bf16.msra.mxu1 %v1451_v50 }
 0x2eb   : > { %v1453_v51 = vpop.eup %1452 }
 0x2ec   : > { %v532_v52 = vsel %vm478_vm1, %v1453_v51, 0.0 }
 0x2ed   : > { %533 = vadd.xlane.f32.xlu1 %v532_v52 }
 0x2fe   : > { %659 = vrot.lane.b32.xlu1 %v1238_v54, %s1718_s1  ;;  %s1723_s1 = smov 24  }
 0x34e   : > { %v646_v56 = vpop.xlane.xlu1 %645 }
 0x34f   : > { %v647_v57 = vsub.f32 %v643_v31, %v646_v56 }
 0x351   : > { %v648_v58 = vmul.f32 1.442695, %v647_v57 }
 0x353   : > { %1454 = vpow2.f32 %v648_v58 }
 0x356   : > { %v772_v59 = vpop.xlane.xlu0 %771 }
 0x357   : > { %v773_v60 = vsub.f32 %v769_v37, %v772_v59 }
 0x359   : > { %v774_v61 = vmul.f32 1.442695, %v773_v60 }
 0x35b   : > { %1456 = vpow2.f32 %v774_v61 }
 0x35d   : > { %v1455_v62 = vpop.eup %1454 }
 0x35e   : > { %v895_v63 = vpop.xlane.xlu0 %894  ;;  %v650_v1 = vsel %vm478_vm1, %v1455_v62, 0.0 }
 0x35f   : > { %v896_v2 = vsub.f32 %v892_v43, %v895_v63  ;;  %651 = vadd.xlane.f32.xlu0 %v650_v1 }
 0x361   : > { %v897_v3 = vmul.f32 1.442695, %v896_v2 }
 0x363   : > { %1458 = vpow2.f32 %v897_v3 }
 0x365   : > { %v1457_v4 = vpop.eup %1456 }
 0x366   : > { %v776_v5 = vsel %vm478_vm1, %v1457_v4, 0.0 }
 0x367   : > { %777 = vadd.xlane.f32.xlu1 %v776_v5 }
 0x36d   : > { %v1459_v6 = vpop.eup %1458 }
 0x36e   : > { %v899_v7 = vsel %vm478_vm1, %v1459_v6, 0.0 }
 0x36f   : > { %900 = vadd.xlane.f32.xlu0 %v899_v7 }
 0x378   : > { %905 = vrot.lane.b32.xlu1 %v1238_v54, %s1720_s20 }
 0x37a   : > { %v534_v8 = vpop.xlane.xlu1 %533 }
 0x37b   : > { %1460 = vrcp.f32 %v534_v8 }
 0x37e   : > { %v660_v10 = vpop.permute.xlu1 %659 }
 0x37f   : > { %v665_v13 = vsel %vm541_vm3, %v660_v10, 0 }
 0x385   : > { %v1461_v9 = vpop.eup %1460  ;;  %782 = vrot.lane.b32.xlu0 %v1238_v54, %s1719_s13  ;;  %s1253_s13 = sshll.u32 %s1700_s30, 7 }
 0x386   : > { %v536_v11 = vmul.f32 %v1461_v9, %v1453_v51  ;;  %s2102_s20 = scalar_lea.hbm %s2191_s8, %s1253_s13 }
 0x388   : > { %588 = vst.msk [vmem:[#allocation3] sm:$0xff] %vm478_vm1, %v536_v11  ;;  %v537_v12 = vpack.c.bf16 %v536_v11, %v536_v11 }
 0x38a   : > { %1299 = vmatmul.mubr.msk.bf16.vlgmr.msra.gmra.mrb[4].mxu0 %vm478_vm1, %v537_v12 }
 0x38b   : > { %1309 = vmatpush3.bf16.msra.mxu0 %v665_v13  ;;  %1310 = vmatprep.mubr.msk.bf16.mxu0 %vm1717_vm0, %v1716_v0 }
 0x38c   : > { %1320 = vmatprep.subr.bf16.mxu0 %v1716_v0 }
 0x38f   : > { %v716_v18 = vld [vmem:[#allocation3] sm:$0xff] }
 0x3ec   : > { %v652_v14 = vpop.xlane.xlu0 %651 }
 0x3ed   : > { %1462 = vrcp.f32 %v652_v14 }
 0x3f4   : > { %v778_v15 = vpop.xlane.xlu1 %777 }
 0x3f5   : > { %1464 = vrcp.f32 %v778_v15 }
 0x3f7   : > { %v1463_v16 = vpop.eup %1462 }
 0x3f8   : > { %v654_v17 = vmul.f32 %v1463_v16, %v1455_v62  ;;  %v906_v25 = vpop.permute.xlu1 %905 }
 0x3f9   : > { %v911_v29 = vsel %vm541_vm3, %v906_v25, 0 }
 0x3fa   : > { %v717_v19 = vadd.f32 %v716_v18, %v654_v17  ;;  %v655_v20 = vpack.c.bf16 %v654_v17, %v654_v17 }
 0x3fc   : > { %718 = vst.msk [vmem:[#allocation3] sm:$0xff] %vm478_vm1, %v717_v19  ;;  %1311 = vmatmul.mubr.msk.bf16.vlgmr.msra.gmra.mrb[8].mxu0 %vm478_vm1, %v655_v20  ;;  %v901_v21 = vpop.xlane.xlu0 %900 }
 0x3fd   : > { %1466 = vrcp.f32 %v901_v21  ;;  %1322 = vmatprep.mubr.msk.bf16.mxu0 %vm1717_vm0, %v1716_v0 }
 0x3ff   : > { %v1465_v22 = vpop.eup %1464 }
 0x400   : > { %v780_v23 = vmul.f32 %v1465_v22, %v1457_v4  ;;  %v783_v24 = vpop.permute.xlu0 %782 }
 0x401   : > { %v788_v26 = vsel %vm541_vm3, %v783_v24, 0 }
 0x402   : > { %1321 = vmatpush3.bf16.msra.mxu0 %v788_v26  ;;  %v781_v27 = vpack.c.bf16 %v780_v23, %v780_v23 }
 0x403   : > { %v839_v28 = vld [vmem:[#allocation3] sm:$0xff]  ;;  %1332 = vmatprep.subr.bf16.mxu0 %v1716_v0 }
 0x404   : > { %v840_v30 = vadd.f32 %v839_v28, %v780_v23 }
 0x405   : > { %1323 = vmatmul.mubr.msk.bf16.vlgmr.msra.gmra.mrb[12].mxu0 %vm478_vm1, %v781_v27 }
 0x406   : > { %841 = vst.msk [vmem:[#allocation3] sm:$0xff] %vm478_vm1, %v840_v30  ;;  %1333 = vmatpush3.bf16.msra.mxu0 %v911_v29  ;;  %1334 = vmatprep.mubr.msk.bf16.mxu0 %vm1717_vm0, %v1716_v0 }
 0x407   : > { %v1467_v31 = vpop.eup %1466 }
 0x408   : > { %v903_v32 = vmul.f32 %v1467_v31, %v1459_v6 }
 0x40a   : > { %v904_v33 = vpack.c.bf16 %v903_v32, %v903_v32 }
 0x40d   : > { %v962_v34 = vld [vmem:[#allocation3] sm:$0xff]  ;;  %1335 = vmatmul.mubr.msk.bf16.vlgmr.msra.gmra.mrb[16].mxu0 %vm478_vm1, %v904_v33 }
 0x40e   : > { %v963_v35 = vadd.f32 %v962_v34, %v903_v32 }
 0x410   : > { %964 = vst.msk [vmem:[#allocation3] sm:$0xff] %vm478_vm1, %v963_v35 }
 0x417   : > { %v1033_v36 = vld [vmem:[#allocation3] sm:$0xff] }
 0x418   : > { %v1034_v37 = vmul.f32 0.25, %v1033_v36 }
 0x41a   : > { %1035 = vst.msk [vmem:[%s404_s17] sm:$0xff] %vm478_vm1, %v1034_v37 }
 0x45d   : > { %v579_v38 = vpop.f32.mrb[4].mxu0 }
 0x45e   : > { %v585_v39 = vpack.c.bf16 %v579_v38, %v579_v38  ;;  %v1300_v40 = vpop.f32.mrb[5].mxu0 }
 0x45f   : > { %v582_v41 = vpop.f32.mrb[6].mxu0 }
 0x460   : > { %587 = vst.msk [vmem:[#allocation2] sm:$0xf] %vm586_vm4, %v585_v39  ;;  %v1301_v42 = vpop.f32.mrb[7].mxu0 }
 0x4cf   : > { %v701_v43 = vpop.f32.mrb[8].mxu0 }
 0x4d0   : > { %v1257_v44 = vpack.c.bf16 %v701_v43, %v701_v43  ;;  %v1312_v45 = vpop.f32.mrb[9].mxu0 }
 0x4d1   : > { %v704_v46 = vpop.f32.mrb[10].mxu0 }
 0x4d2   : > { %711 = vrot.lane.b32.xlu1 %v1257_v44, %s1721_s22  ;;  %v1313_v47 = vpop.f32.mrb[11].mxu0  ;;  %s1070_s22 = sshll.u32 %s404_s17, 4  ;;  %s1071_s22 = int_to_ptr.vmem [resolvable:$true] %s1070_s22 }
 0x4d3   : > { %s1586_s19 = scalar_lea.vmem %s1071_s22, 128  ;;  %p1593_p5 = scmp.lt.s32.totalorder %s1071_s22, %s1591_s14 }
 0x4d4   : > { %p1587_p11 = scmp.ne.s32.totalorder %s1071_s22, %s1586_s19 }
 0x4d6   : > { %p1588_p12 = pnand %p1587_p11, %p1941_p7 }
 0x4d8   : > { %v824_v49 = vpop.f32.mrb[12].mxu0  ;;  %p1589_p0 = pneg %p1588_p12 }
 0x4d9   : > { %v1258_v51 = vpack.c.bf16 %v824_v49, %v824_v49  ;;  %v1324_v52 = vpop.f32.mrb[13].mxu0 }
 0x4da   : > { %v827_v53 = vpop.f32.mrb[14].mxu0 }
 0x4db   : > { %834 = vrot.lane.b32.xlu0 %v1258_v51, %s1722_s26  ;;  %v1325_v54 = vpop.f32.mrb[15].mxu0  ;;  %s1592_s26 = scalar_lea.vmem %s1591_s14, 256 }
 0x4dc   : > { %p1594_p4 = scmp.lt.s32.totalorder %s1592_s26, %s1586_s19 }
 0x4de   : > { %p1595_p6 = por %p1594_p4, %p1593_p5 }
 0x4e0   : > { %v947_v55 = vpop.f32.mrb[16].mxu0  ;;  %p1596_p2 = pnand %p1595_p6, %p1589_p0 }
 0x4e1   : > { %v1259_v56 = vpack.c.bf16 %v947_v55, %v947_v55  ;;  %v1336_v57 = vpop.f32.mrb[17].mxu0 }
 0x4e2   : > { %v950_v58 = vpop.f32.mrb[18].mxu0 }
 0x4e3   : > { %957 = vrot.lane.b32.xlu1 %v1259_v56, %s1723_s1  ;;  %v1337_v59 = vpop.f32.mrb[19].mxu0 }
 0x544   : > { %v712_v60 = vpop.permute.xlu1 %711 }
 0x545   : > { %715 = vst.msk [vmem:[#allocation2] sm:$0xf] %vm714_vm5, %v712_v60 }
 0x54d   : > { %v835_v0 = vpop.permute.xlu0 %834 }
 0x54e   : > { %838 = vst.msk [vmem:[#allocation2] sm:$0xf] %vm837_vm6, %v835_v0 }
 0x555   : > { %v958_v61 = vpop.permute.xlu1 %957 }
 0x556   : > { %961 = vst.msk [vmem:[#allocation2] sm:$0xf] %vm960_vm7, %v958_v61 }
 0x55d   : > { %v965_v62 = vld [vmem:[#allocation2] sm:$0xf] }
 0x55e   : > { %1343 = vmatmul.mubr.msk.bf16.vlgmr.msra.gmra.mrb[16].mxu1 %vm431_vm2, %v965_v62 }
 0x55f   : > { %1599 = shalt.err (!%p1596_p2)
}
 0x560   : > { %s1600_s17 = scalar_lea.hbm %s2102_s20, 128  ;;  %s1604_s18 = scalar_lea.hbm %s2191_s8, 256 }
 0x561   : > { %p1601_p10 = scmp.ne.s32.totalorder %s2102_s20, %s1600_s17  ;;  %p1605_p9 = scmp.lt.u32.totalorder %s2102_s20, %s2191_s8 }
 0x562   : > { %p1606_p1 = scmp.lt.u32.totalorder %s1604_s18, %s1600_s17  ;;  %p1608_p11 = scmp.lt.u32.totalorder %s1600_s17, %s2102_s20 }
 0x563   : > { %p1602_p8 = pnand %p1601_p10, %p1941_p7 }
 0x564   : > { %p1607_p13 = por %p1606_p1, %p1605_p9 }
 0x565   : > { %p1603_p3 = pneg %p1602_p8 }
 0x566   : > { %p1609_p12 = por %p1608_p11, %p1607_p13 }
 0x568   : > { %p1610_p0 = pnand %p1609_p12, %p1603_p3 }
 0x56a   : > { %1613 = shalt.err (!%p1610_p0)
}
 0x56b   : > { %1357 = dma.vmem_to_hbm [thread:$0]  (%p1941_p7), %s1071_s22, 128, %s2102_s20, %s1042_s12   ;;  %v1247_v63 = vld [vmem:[%s2189_s6] ss:$0 sm:$0xff] }
 0x56c   : > { %s397_s1 = scalar_lea.vmem [#allocation12], %s1996_s21  ;;  %s2133_s23 = scalar_lea.hbm %s2190_s7, %s1253_s13 }
 0x56d   : > { %s1056_s15 = sshll.u32 %s397_s1, 4  ;;  %s1037_s21 = scalar_lea.sflag [#allocation6], %s1993_s16  ;;  %s2135_s15 = int_to_ptr.vmem [resolvable:$true] %s1056_s15 }
 0x56e   : > { %s1614_s20 = scalar_lea.vmem %s2135_s15, 128  ;;  %s1725_s30 = smov [#allocation12]  }
 0x56f   : > { %p1615_p5 = scmp.ne.s32.totalorder %s2135_s15, %s1614_s20  ;;  %s1618_s22 = sshll.u32 %s1725_s30, 4  ;;  %s1619_s22 = int_to_ptr.vmem [resolvable:$false] %s1618_s22 }
 0x570   : > { %s1620_s13 = scalar_lea.vmem %s1619_s22, 256  ;;  %p1621_p2 = scmp.lt.s32.totalorder %s2135_s15, %s1619_s22 }
 0x571   : > { %p1616_p4 = pnand %p1615_p5, %p1941_p7  ;;  %p1622_p10 = scmp.lt.s32.totalorder %s1620_s13, %s1614_s20 }
 0x573   : > { %p1617_p6 = pneg %p1616_p4  ;;  %p1623_p8 = por %p1622_p10, %p1621_p2 }
 0x575   : > { %p1624_p3 = pnand %p1623_p8, %p1617_p6 }
 0x631   : > { %v1026_v1 = vpop.f32.mrb[16].mxu1 }
 0x632   : > { %v1027_v2 = vadd.f32 %v1247_v63, %v1026_v1  ;;  %v1344_v3 = vpop.f32.mrb[17].mxu1 }
 0x633   : > { %v1029_v4 = vpop.f32.mrb[18].mxu1 }
 0x634   : > { %v1345_v5 = vpop.f32.mrb[19].mxu1  ;;  %1032 = vst.msk [vmem:[%s397_s1] sm:$0xff] %vm431_vm2, %v1027_v2 }
 0x635   : > { %1627 = shalt.err (!%p1624_p3)
}
 0x636   : > { %s1628_s16 = scalar_lea.hbm %s2133_s23, 128  ;;  %s1632_s19 = scalar_lea.hbm %s2190_s7, 256 }
 0x637   : > { %p1629_p9 = scmp.ne.s32.totalorder %s2133_s23, %s1628_s16  ;;  %p1633_p11 = scmp.lt.u32.totalorder %s2133_s23, %s2190_s7 }
 0x638   : > { %p1634_p12 = scmp.lt.u32.totalorder %s1632_s19, %s1628_s16  ;;  %p1636_p5 = scmp.lt.u32.totalorder %s1628_s16, %s2133_s23 }
 0x639   : > { %p1630_p1 = pnand %p1629_p9, %p1941_p7 }
 0x63a   : > { %p1635_p0 = por %p1634_p12, %p1633_p11 }
 0x63b   : > { %p1631_p13 = pneg %p1630_p1 }
 0x63c   : > { %p1637_p4 = por %p1636_p5, %p1635_p0 }
 0x63e   : > { %p1638_p6 = pnand %p1637_p4, %p1631_p13 }
 0x640   : > { %1641 = shalt.err (!%p1638_p6)
}
 0x641   : > { %1356 = dma.vmem_to_hbm [thread:$0]  (%p1941_p7), %s2135_s15, 128, %s2133_s23, %s1037_s21  }
 0x642 PF: > { %s2219_s17 = sld [smem:[#allocation20_spill]]  ;;  %s1082_s18 = sand.u32 1, %s1688_s27  }
 0x643   : > { %p2221_p10 = scmp.ge.s32.totalorder %s1708_s10, 2  ;;  %s1083_s20 = scalar_lea.sflag [#allocation6], %s1082_s18 }
 0x648   : > { %p2220_p2 = scmp.ne.s32.totalorder %s2219_s17, 0 }
 0x64a   : > { %p1375_p8 = pnand %p2221_p10, %p2220_p2 }
 0x64c   : > { %1679 = dma.done.wait (!%p1375_p8), %s1083_s20, 128  }
 0x64d   : > { %1681 = vsyncadd (!%p1375_p8), %s1083_s20, 4294967168  ;;  %s1092_s30 = scalar_lea.sflag [#allocation14], %s1082_s18 }
 0x64e   : > { %1683 = dma.done.wait (!%p1375_p8), %s1092_s30, 128  }
 0x64f   : > { %1685 = vsyncadd (!%p1375_p8), %s1092_s30, 4294967168  ;;  %s30_s10 = sadd.s32 1, %s1708_s10   ;;  %s2222_s27 = smov %s1692_s28 }
 0x650   : > { %p27_p3 = scmp.ge.s32.totalorder %s30_s10, 4   ;;  %s2223_s28 = smov %s1696_s29 }
 0x651   : > { %s2224_s29 = smov %s1950_s25  ;;  %s2225_s30 = smov %s1704_s9 }
 0x652   : > { %s2226_s9 = smov %s2228_s11  ;;  %29 = sbr.rel (!%p27_p3) target bundleno = 12 (0xc), region = 124 }
 0x659   :  { %1097 = vsyncpa [#allocation5], 1 }
 0x65a   :  { %1099 = vsyncpa [#allocation5 + $0x1], 1 }
 0x65b   :  { %1100 = vsyncpa [#allocation8], 1 }
 0x65c   :  { %1101 = vsyncpa [#allocation11], 1 }
 0x65d   :  { %1102 = vsyncpa [#allocation6], 1 }
 0x65e   :  { %1104 = vsyncpa [#allocation6 + $0x1], 1 }
 0x65f   :  { %1105 = vsyncpa [#allocation14], 1 }
 0x660   :  { %1107 = vsyncpa [#allocation14 + $0x1], 1 }

</bundles_post_ra>
